<compile_context>
chip_gen: v5e
topology: v5e:2x2
jax: 0.10.0
libtpu: 0.0.40
codegen_flags: <defaults>
</compile_context>

<pallas_src>
import jax
import jax.numpy as jnp
from jax.experimental import pallas as pl
from jax.experimental.pallas import tpu as pltpu


def decoder_kernel(x_ref, w1_ref, b1_ref, w2_ref, b2_ref, w3_ref, b3_ref, o_ref):
    """Fused 3-layer MLP forward for one batch tile; all compute in VMEM."""
    x = x_ref[...]
    # Layer 1: (tile, latent) @ (latent, h1) -> fp32 accumulate, bias add, ReLU.
    h = jnp.dot(x, w1_ref[...], preferred_element_type=jnp.float32) + b1_ref[...]
    h = jnp.maximum(h, 0.0).astype(w2_ref.dtype)   # cast only the MXU operand
    # Layer 2
    h = jnp.dot(h, w2_ref[...], preferred_element_type=jnp.float32) + b2_ref[...]
    h = jnp.maximum(h, 0.0).astype(w3_ref.dtype)
    # Layer 3 (no activation)
    out = jnp.dot(h, w3_ref[...], preferred_element_type=jnp.float32) + b3_ref[...]
    o_ref[...] = out.astype(o_ref.dtype)


def _round_up(v, m):
    return -(-v // m) * m


def _choose_batch_tile(batch, latent_dim, h1, h2, out_dim, x_bytes, out_bytes,
                       max_tile=4096, vmem_budget_bytes=12 * 1024 * 1024):
    """Pick the largest batch tile that (a) fits a conservative VMEM budget,
    (b) is a multiple of 8 sublanes, and (c) leaves >= 2 grid steps whenever the
    batch allows it (so v7x can shard the parallel axis across its 2 TCs)."""
    # Per-row footprint: double-buffered x tile + out tile, plus fp32
    # intermediates (h1, h2, pre-cast out) materialized inside the kernel.
    per_row = (2 * latent_dim * x_bytes + 2 * out_dim * out_bytes
               + (h1 + h2 + out_dim) * 4)
    fit = max(8, (vmem_budget_bytes // per_row) // 8 * 8)
    b8 = _round_up(batch, 8)
    tile = max(8, min(max_tile, fit, b8) // 8 * 8)
    if b8 > 8 and tile >= b8:
        # Split into (at least) two grid steps instead of one giant step.
        tile = max(8, _round_up(b8 // 2, 8))
    b_pad = _round_up(b8, tile)
    return tile, b_pad


def decoder_forward(x, params, *, batch_tile=None, out_dtype=None):
    """x: (B, latent_dim). params: dict of (in, out) weights and (1, out) biases."""
    w1, b1, w2, b2, w3, b3 = (params[k] for k in ("w1", "b1", "w2", "b2", "w3", "b3"))
    batch, latent_dim = x.shape
    h1_dim, h2_dim, out_dim = w1.shape[1], w2.shape[1], w3.shape[1]
    out_dtype = x.dtype if out_dtype is None else jnp.dtype(out_dtype)

    if batch_tile is None:
        batch_tile, b_pad = _choose_batch_tile(
            batch, latent_dim, h1_dim, h2_dim, out_dim,
            x.dtype.itemsize, jnp.dtype(out_dtype).itemsize)
    else:
        assert batch_tile % 8 == 0, "batch_tile must be a multiple of 8 sublanes"
        b_pad = _round_up(batch, batch_tile)

    # Ragged batch support: zero-pad to a multiple of the tile, slice on the way out.
    x_in = x if b_pad == batch else jnp.zeros((b_pad, latent_dim), x.dtype).at[:batch].set(x)

    grid = (b_pad // batch_tile,)

    in_specs = [
        pl.BlockSpec((batch_tile, latent_dim), lambda i: (i, 0)),   # x tile (pipelined)
        # Weights / biases: block (0, 0) for every grid step => DMA'd once, then
        # resident in VMEM for the rest of the grid (never re-fetched).
        pl.BlockSpec((latent_dim, h1_dim), lambda i: (0, 0)),       # w1
        pl.BlockSpec((1, h1_dim), lambda i: (0, 0)),                # b1
        pl.BlockSpec((h1_dim, h2_dim), lambda i: (0, 0)),           # w2
        pl.BlockSpec((1, h2_dim), lambda i: (0, 0)),                # b2
        pl.BlockSpec((h2_dim, out_dim), lambda i: (0, 0)),          # w3
        pl.BlockSpec((1, out_dim), lambda i: (0, 0)),               # b3
    ]
    out_specs = pl.BlockSpec((batch_tile, out_dim), lambda i: (i, 0))

    # Advisory cost estimate so XLA schedules/overlaps this mem-bound call sanely.
    flops = 2 * b_pad * (latent_dim * h1_dim + h1_dim * h2_dim + h2_dim * out_dim)
    weight_bytes = sum(int(a.size) * a.dtype.itemsize for a in (w1, b1, w2, b2, w3, b3))
    bytes_accessed = (b_pad * latent_dim * x.dtype.itemsize
                      + b_pad * out_dim * jnp.dtype(out_dtype).itemsize
                      + weight_bytes)

    out = pl.pallas_call(
        decoder_kernel,
        out_shape=jax.ShapeDtypeStruct((b_pad, out_dim), out_dtype),
        grid_spec=pltpu.PrefetchScalarGridSpec(
            num_scalar_prefetch=0,
            grid=grid,
            in_specs=in_specs,
            out_specs=out_specs,
        ),
        compiler_params=pltpu.CompilerParams(
            dimension_semantics=("parallel",),      # batch tiles are independent
            # Explicit scoped-VMEM budget: valid on every generation (v7x: 64 MiB
            # physical / 32 MiB default, v5e default is only 16 MiB) and leaves
            # >2x headroom over the ~12 MiB the tile chooser targets.
            vmem_limit_bytes=32 * 1024 * 1024,
        ),
        cost_estimate=pl.CostEstimate(
            flops=flops, transcendentals=0, bytes_accessed=bytes_accessed),
    )(x_in, w1, b1, w2, b2, w3, b3)

    return out if b_pad == batch else out[:batch]


def init_decoder_params(key, latent_dim, output_dim, dtype=jnp.float32):
    """Deterministic synthetic init matching nn.Linear shapes.
    PyTorch Linear stores W as (out, in); we keep the transposed (in, out) layout."""
    h1 = output_dim // 4
    h2 = output_dim // 2
    k1, k2, k3, k4, k5, k6 = jax.random.split(key, 6)

    def lin(kw, kb, fan_in, fan_out):
        bound = 1.0 / jnp.sqrt(fan_in)
        w = jax.random.uniform(kw, (fan_in, fan_out), dtype, -bound, bound)
        b = jax.random.uniform(kb, (1, fan_out), jnp.float32, -bound, bound)
        return w, b

    w1, b1 = lin(k1, k2, latent_dim, h1)
    w2, b2 = lin(k3, k4, h1, h2)
    w3, b3 = lin(k5, k6, h2, output_dim)
    return {"w1": w1, "b1": b1, "w2": w2, "b2": b2, "w3": w3, "b3": b3}


def decoder_reference(x, params):
    """Pure-JAX reference with the same cast points as the kernel."""
    h = jnp.dot(x, params["w1"], preferred_element_type=jnp.float32) + params["b1"]
    h = jnp.maximum(h, 0.0).astype(params["w2"].dtype)
    h = jnp.dot(h, params["w2"], preferred_element_type=jnp.float32) + params["b2"]
    h = jnp.maximum(h, 0.0).astype(params["w3"].dtype)
    return jnp.dot(h, params["w3"], preferred_element_type=jnp.float32) + params["b3"]


if __name__ == "__main__":
    latent_dim = 32
    output_dim = 128   # hidden dims: 32, 64
    batch = 512        # big enough to exercise tiling with a grid of >= 2 steps

    key = jax.random.PRNGKey(0)
    kx, kp = jax.random.split(key)
    x = jax.random.normal(kx, (batch, latent_dim), dtype=jnp.float32)
    params = init_decoder_params(kp, latent_dim, output_dim)

    # fp32 path (matches the PyTorch module's default precision).
    out = jax.block_until_ready(decoder_forward(x, params))
    ref = decoder_reference(x, params)
    assert out.shape == (batch, output_dim), out.shape
    assert jnp.allclose(out, ref, atol=1e-3, rtol=1e-3), "fp32 mismatch vs reference"

    # Ragged batch (not a multiple of the tile): wrapper pads and slices.
    out_r = jax.block_until_ready(decoder_forward(x[:437], params))
    assert out_r.shape == (437, output_dim), out_r.shape
    assert jnp.allclose(out_r, ref[:437], atol=1e-3, rtol=1e-3), "ragged mismatch"

    # bf16 storage for x / weights (halves HBM traffic on v6e/v7x); fp32 accumulation.
    params_bf16 = {k: (v.astype(jnp.bfloat16) if k.startswith("w") else v)
                   for k, v in params.items()}
    x_bf16 = x.astype(jnp.bfloat16)
    out_bf = jax.block_until_ready(decoder_forward(x_bf16, params_bf16))
    ref_bf = decoder_reference(x_bf16, params_bf16)
    assert out_bf.shape == (batch, output_dim), out_bf.shape
    assert jnp.allclose(out_bf.astype(jnp.float32), ref_bf.astype(jnp.float32),
                        atol=5e-2, rtol=5e-2), "bf16 mismatch vs reference"

    print("KERNEL_OK")
</pallas_src>

<mosaic_0001>
module attributes {stable_mosaic.version = 11 : i64} {
  func.func @decoder_kernel(%arg0: i32, %arg1: memref<256x32xf32, #tpu.memory_space<vmem>>, %arg2: memref<32x32xf32, #tpu.memory_space<vmem>>, %arg3: memref<1x32xf32, #tpu.memory_space<vmem>>, %arg4: memref<32x64xf32, #tpu.memory_space<vmem>>, %arg5: memref<1x64xf32, #tpu.memory_space<vmem>>, %arg6: memref<64x128xf32, #tpu.memory_space<vmem>>, %arg7: memref<1x128xf32, #tpu.memory_space<vmem>>, %arg8: memref<256x128xf32, #tpu.memory_space<vmem>>) attributes {dimension_semantics = [#tpu.dimension_semantics<parallel>], iteration_bounds = array<i64: 2>, scalar_prefetch = 0 : i64, scratch_operands = 0 : i64, tpu.core_type = #tpu.core_type<tc>, window_params = [{transform_indices = @transform_0, window_bounds = array<i64: 256, 32>}, {pipeline_mode = #tpu.pipeline_mode<synchronous>, transform_indices = @transform_1, window_bounds = array<i64: 32, 32>}, {pipeline_mode = #tpu.pipeline_mode<synchronous>, transform_indices = @transform_2, window_bounds = array<i64: 1, 32>}, {pipeline_mode = #tpu.pipeline_mode<synchronous>, transform_indices = @transform_3, window_bounds = array<i64: 32, 64>}, {pipeline_mode = #tpu.pipeline_mode<synchronous>, transform_indices = @transform_4, window_bounds = array<i64: 1, 64>}, {pipeline_mode = #tpu.pipeline_mode<synchronous>, transform_indices = @transform_5, window_bounds = array<i64: 64, 128>}, {pipeline_mode = #tpu.pipeline_mode<synchronous>, transform_indices = @transform_6, window_bounds = array<i64: 1, 128>}, {transform_indices = @transform_7, window_bounds = array<i64: 256, 128>}]} {
    %c0 = arith.constant 0 : index
    %c0_0 = arith.constant 0 : index
    %0 = vector.load %arg1[%c0, %c0_0] : memref<256x32xf32, #tpu.memory_space<vmem>>, vector<256x32xf32>
    %c0_1 = arith.constant 0 : index
    %c0_2 = arith.constant 0 : index
    %1 = vector.load %arg2[%c0_1, %c0_2] : memref<32x32xf32, #tpu.memory_space<vmem>>, vector<32x32xf32>
    %cst = arith.constant dense<0.000000e+00> : vector<256x32xf32>
    %2 = tpu.matmul %0, %1, %cst {dimension_numbers = #tpu.dot_dimension_numbers<[1], [0], [0], [1], [0, 0, 1, 1], [], []>} : vector<256x32xf32>, vector<32x32xf32>, vector<256x32xf32> -> vector<256x32xf32>
    %c0_3 = arith.constant 0 : index
    %c0_4 = arith.constant 0 : index
    %3 = vector.load %arg3[%c0_3, %c0_4] : memref<1x32xf32, #tpu.memory_space<vmem>>, vector<1x32xf32>
    %4 = vector.broadcast %3 : vector<1x32xf32> to vector<256x32xf32>
    %5 = arith.addf %2, %4 : vector<256x32xf32>
    %cst_5 = arith.constant 0.000000e+00 : f32
    %6 = vector.broadcast %cst_5 : f32 to vector<256x32xf32>
    %7 = arith.maximumf %5, %6 : vector<256x32xf32>
    %c0_6 = arith.constant 0 : index
    %c0_7 = arith.constant 0 : index
    %8 = vector.load %arg4[%c0_6, %c0_7] : memref<32x64xf32, #tpu.memory_space<vmem>>, vector<32x64xf32>
    %cst_8 = arith.constant dense<0.000000e+00> : vector<256x64xf32>
    %9 = tpu.matmul %7, %8, %cst_8 {dimension_numbers = #tpu.dot_dimension_numbers<[1], [0], [0], [1], [0, 0, 1, 1], [], []>} : vector<256x32xf32>, vector<32x64xf32>, vector<256x64xf32> -> vector<256x64xf32>
    %c0_9 = arith.constant 0 : index
    %c0_10 = arith.constant 0 : index
    %10 = vector.load %arg5[%c0_9, %c0_10] : memref<1x64xf32, #tpu.memory_space<vmem>>, vector<1x64xf32>
    %11 = vector.broadcast %10 : vector<1x64xf32> to vector<256x64xf32>
    %12 = arith.addf %9, %11 : vector<256x64xf32>
    %cst_11 = arith.constant 0.000000e+00 : f32
    %13 = vector.broadcast %cst_11 : f32 to vector<256x64xf32>
    %14 = arith.maximumf %12, %13 : vector<256x64xf32>
    %c0_12 = arith.constant 0 : index
    %c0_13 = arith.constant 0 : index
    %15 = vector.load %arg6[%c0_12, %c0_13] : memref<64x128xf32, #tpu.memory_space<vmem>>, vector<64x128xf32>
    %cst_14 = arith.constant dense<0.000000e+00> : vector<256x128xf32>
    %16 = tpu.matmul %14, %15, %cst_14 {dimension_numbers = #tpu.dot_dimension_numbers<[1], [0], [0], [1], [0, 0, 1, 1], [], []>} : vector<256x64xf32>, vector<64x128xf32>, vector<256x128xf32> -> vector<256x128xf32>
    %c0_15 = arith.constant 0 : index
    %c0_16 = arith.constant 0 : index
    %17 = vector.load %arg7[%c0_15, %c0_16] : memref<1x128xf32, #tpu.memory_space<vmem>>, vector<1x128xf32>
    %18 = vector.broadcast %17 : vector<1x128xf32> to vector<256x128xf32>
    %19 = arith.addf %16, %18 : vector<256x128xf32>
    %c0_17 = arith.constant 0 : index
    %c0_18 = arith.constant 0 : index
    %20 = vector.load %arg8[%c0_17, %c0_18] : memref<256x128xf32, #tpu.memory_space<vmem>>, vector<256x128xf32>
    tpu.vector_store %arg8[%c0_17, %c0_18], %19 {strides = array<i32>} : memref<256x128xf32, #tpu.memory_space<vmem>>, vector<256x128xf32>,
    return
  }
  func.func @transform_0(%arg0: i32) -> (i32, i32) {
    %c0_i32 = arith.constant 0 : i32
    %c0_i32_0 = arith.constant 0 : i32
    return %arg0, %c0_i32 : i32, i32
  }
  func.func @transform_1(%arg0: i32) -> (i32, i32) {
    %c0_i32 = arith.constant 0 : i32
    %c0_i32_0 = arith.constant 0 : i32
    %c0_i32_1 = arith.constant 0 : i32
    return %c0_i32, %c0_i32_0 : i32, i32
  }
  func.func @transform_2(%arg0: i32) -> (i32, i32) {
    %c0_i32 = arith.constant 0 : i32
    %c0_i32_0 = arith.constant 0 : i32
    %c0_i32_1 = arith.constant 0 : i32
    return %c0_i32, %c0_i32_0 : i32, i32
  }
  func.func @transform_3(%arg0: i32) -> (i32, i32) {
    %c0_i32 = arith.constant 0 : i32
    %c0_i32_0 = arith.constant 0 : i32
    %c0_i32_1 = arith.constant 0 : i32
    return %c0_i32, %c0_i32_0 : i32, i32
  }
  func.func @transform_4(%arg0: i32) -> (i32, i32) {
    %c0_i32 = arith.constant 0 : i32
    %c0_i32_0 = arith.constant 0 : i32
    %c0_i32_1 = arith.constant 0 : i32
    return %c0_i32, %c0_i32_0 : i32, i32
  }
  func.func @transform_5(%arg0: i32) -> (i32, i32) {
    %c0_i32 = arith.constant 0 : i32
    %c0_i32_0 = arith.constant 0 : i32
    %c0_i32_1 = arith.constant 0 : i32
    return %c0_i32, %c0_i32_0 : i32, i32
  }
  func.func @transform_6(%arg0: i32) -> (i32, i32) {
    %c0_i32 = arith.constant 0 : i32
    %c0_i32_0 = arith.constant 0 : i32
    %c0_i32_1 = arith.constant 0 : i32
    return %c0_i32, %c0_i32_0 : i32, i32
  }
  func.func @transform_7(%arg0: i32) -> (i32, i32) {
    %c0_i32 = arith.constant 0 : i32
    %c0_i32_0 = arith.constant 0 : i32
    return %arg0, %c0_i32 : i32, i32
  }
}

</mosaic_0001>

<bundles_post_ra>
// kernel: tpu_custom_call.1
= control target key start
LH: loop header
LB: loop body
LE: loop exit
PB: predicated region body
PF: predicated region fallthrough
CT: control target
= control target key end

     0   :  { %12 = vsyncpa [#allocation3], 0  ;;  %s1830_s0 = inlined_call_operand.vmem [shape: f32[512,32], index: 0, kind: input, shape index: {}]   ;;  %s1831_s1 = inlined_call_operand.vmem [shape: f32[32,32], index: 1, kind: input, shape index: {}]   ;;  %s1832_s2 = inlined_call_operand.vmem [shape: f32[1,32], index: 2, kind: input, shape index: {}]   ;;  %s1833_s3 = inlined_call_operand.vmem [shape: f32[32,64], index: 3, kind: input, shape index: {}]   ;;  %s1834_s4 = inlined_call_operand.vmem [shape: f32[1,64], index: 4, kind: input, shape index: {}]   ;;  %s1835_s5 = inlined_call_operand.vmem [shape: f32[64,128], index: 5, kind: input, shape index: {}]   ;;  %s1836_s6 = inlined_call_operand.vmem [shape: f32[1,128], index: 6, kind: input, shape index: {}]   ;;  %s1837_s7 = inlined_call_operand.hbm [shape: f32[512,128], index: 7, kind: output, shape index: {}]  }
   0x1   :  { %14 = vsyncpa [#allocation3 + $0x1], 0  ;;  %s1418_s24 = smov 0   ;;  %s1420_s25 = smov 0  }
   0x2   :  { %s1422_s26 = smov 0   ;;  %s1424_s27 = smov 0  }
   0x3 LB: > { %s1439_s28 = sadd.s32 4294967295, %s1374_s27   ;;  %s1143_s29 = sadd.s32 4294967294, %s1374_s27   ;;  %s1374_s27 = sphi %s1424_s27, %s1843_s27   ;;  %s1370_s26 = sphi %s1422_s26, %s1842_s26   ;;  %s1366_s25 = sphi %s1420_s25, %s1841_s25   ;;  %s1362_s24 = sphi %s1418_s24, %s1840_s24  }
   0x4   : > { %s1443_s30 = sadd.s32 1, %s1374_s27   ;;  %s179_s8 = sadd.s32 1, %s1370_s26 }
   0x5   : > { %s176_s9 = ssub.s32 %s1374_s27, %s1443_s30  ;;  %p189_p0 = scmp.ne.s32.totalorder %s1370_s26, %s1366_s25 }
   0x6   : > { %p177_p1 = scmp.eq.s32.totalorder %s176_s9, 0  ;;  %p190_p2 = scmp.eq.s32.totalorder %s1439_s28, 1 }
   0x7   : > { %p195_p3 = scmp.ne.s32.totalorder %s1366_s25, %s1362_s24  ;;  %p196_p4 = scmp.eq.s32.totalorder %s1143_s29, 1 }
   0x8   : > { %s1454_s10 = scalar_select %p177_p1, %s1370_s26, %s179_s8  }
   0x9   : > { %p1456_p5 = por %p190_p2, %p189_p0  ;;  %p1460_p6 = por %p196_p4, %p195_p3 }
   0xa   : > { %p1146_p7 = scmp.ge.s32.totalorder %s1374_s27, 1  ;;  %p241_p8 = scmp.lt.s32.totalorder %s1374_s27, 3 }
   0xc   : > { %p242_p9 = pnand %p1146_p7, %p241_p8 }
   0xd   : > { %s1148_s17 = sshll.u32 (!%p242_p9), %s1439_s28, 5  ;;  %s1332_s14 = scalar_lea.hbm (!%p242_p9), %s1837_s7, 512 }
   0xe   : > { %245 = sbr.rel (%p242_p9) target bundleno = 673 (0x2a1), region = 48  ;;  %p274_p10 = scmp.lt.s32.totalorder (!%p242_p9), %s1148_s17, 63 }
  0x13   : > { %v315_v0 = vld [vmem:[%s1831_s1 + $0x18] sm:$0xff]  ;;  %v314_v1 = vld [vmem:[%s1831_s1 + $0x10] sm:$0xff]  ;;  %v313_v2 = vld [vmem:[%s1831_s1 + $0x8] sm:$0xff]  ;;  %s1845_s17 = smov (!%p274_p10, %s1148_s17), 63  ;;  %vm320_vm0 = vcmask 261120   ;;  %vm823_vm1 = vcmask 523264  }
  0x14   : > { %429 = vmatpush.msra.mxu0 %v315_v0  ;;  %1252 = vmatpush.msra.mxu3 %v315_v0  ;;  %v312_v3 = vld [vmem:[%s1831_s1] sm:$0xff]  ;;  %s1149_s22 = sshll.u32 %s1845_s17, 3  ;;  %v565_v16 = vld [vmem:[%s1833_s3 + $0x18] sm:$0xff]  ;;  %v564_v17 = vld [vmem:[%s1833_s3 + $0x10] sm:$0xff]  ;;  %s1251_s17 = sshll.u32 %s1439_s28, 8 }
  0x15   : > { %s1482_s8 = scalar_lea.vmem %s1830_s0, %s1149_s22  ;;  %678 = vmatpush.msra.mxu1 %v565_v16  ;;  %v563_v19 = vld [vmem:[%s1833_s3 + $0x8] sm:$0xff]  ;;  %v562_v20 = vld [vmem:[%s1833_s3] sm:$0xff]  ;;  %s1077_s20 = scalar_lea.hbm %s1837_s7, %s1251_s17 }
  0x16   : > { %430 = vmatpush.msra.mxu0 %v314_v1  ;;  %1253 = vmatpush.msra.mxu3 %v314_v1  ;;  %v280_v4 = vld [vmem:[%s1482_s8] sm:$0xff]  ;;  %v281_v5 = vld [vmem:[%s1482_s8 + $0x8] sm:$0xff]  ;;  %v282_v6 = vld [vmem:[%s1482_s8 + $0x10] sm:$0xff]  ;;  %s1080_s22 = sshll.u32 %s1077_s20, 4  ;;  %s1081_s22 = int_to_ptr.hbm [resolvable:$true] %s1080_s22 }
  0x17   : > { %v283_v7 = vld [vmem:[%s1482_s8 + $0x18] sm:$0xff]  ;;  %v284_v8 = vld [vmem:[%s1482_s8 + $0x20] sm:$0xff]  ;;  %v285_v9 = vld [vmem:[%s1482_s8 + $0x28] sm:$0xff]  ;;  %679 = vmatpush.msra.mxu1 %v564_v17  ;;  %s1326_s28 = sshra.s32 %s1081_s22, 4  ;;  %s1327_s28 = int_to_ptr.hbm [resolvable:$true] %s1326_s28 }
  0x18   : > { %431 = vmatpush.msra.mxu0 %v313_v2  ;;  %1254 = vmatpush.msra.mxu3 %v313_v2  ;;  %v286_v10 = vld [vmem:[%s1482_s8 + $0x30] sm:$0xff]  ;;  %v287_v11 = vld [vmem:[%s1482_s8 + $0x38] sm:$0xff]  ;;  %v288_v12 = vld [vmem:[%s1482_s8 + $0x40] sm:$0xff]  ;;  %s1328_s29 = scalar_lea.hbm %s1327_s28, 256  ;;  %p1333_p0 = scmp.lt.s32.totalorder %s1327_s28, %s1837_s7 }
  0x19   : > { %v289_v13 = vld [vmem:[%s1482_s8 + $0x48] sm:$0xff]  ;;  %v290_v14 = vld [vmem:[%s1482_s8 + $0x50] sm:$0xff]  ;;  %v291_v15 = vld [vmem:[%s1482_s8 + $0x58] sm:$0xff]  ;;  %680 = vmatpush.msra.mxu1 %v563_v19  ;;  %p1329_p11 = scmp.ne.s32.totalorder %s1327_s28, %s1328_s29  ;;  %p1334_p1 = scmp.lt.s32.totalorder %s1332_s14, %s1328_s29 }
  0x1a   : > { %432 = vmatpush.msra.mxu0 %v312_v3  ;;  %1255 = vmatpush.msra.mxu3 %v312_v3  ;;  %v292_v18 = vld [vmem:[%s1482_s8 + $0x60] sm:$0xff]  ;;  %v293_v21 = vld [vmem:[%s1482_s8 + $0x68] sm:$0xff]  ;;  %v294_v22 = vld [vmem:[%s1482_s8 + $0x70] sm:$0xff] }
  0x1b   : > { %1150 = vmatmul.msk.f32.vlgmr.msra.gmra.mxu0 %vm320_vm0, %v280_v4  ;;  %681 = vmatpush.msra.mxu1 %v562_v20  ;;  %v295_v23 = vld [vmem:[%s1482_s8 + $0x78] sm:$0xff]  ;;  %v1531_v24 = vld [vmem:[%s1832_s2] ss:$0 sm:$0xff]  ;;  %v297_v30 = vld [vmem:[%s1482_s8 + $0x88] sm:$0xff]  ;;  %p1330_p12 = pnand %p1329_p11, %p1456_p5  ;;  %p1335_p2 = por %p1334_p1, %p1333_p0 }
  0x1c   : > { %1256 = vmatpush.msrb.mxu3 %v565_v16  ;;  %v296_v26 = vld [vmem:[%s1482_s8 + $0x80] sm:$0xff]  ;;  %v298_v34 = vld [vmem:[%s1482_s8 + $0x90] sm:$0xff]  ;;  %v299_v38 = vld [vmem:[%s1482_s8 + $0x98] sm:$0xff] }
  0x1d   : > { %v305_v41 = vld [vmem:[%s1482_s8 + $0xc8] sm:$0xff]  ;;  %v300_v43 = vld [vmem:[%s1482_s8 + $0xa0] sm:$0xff]  ;;  %v306_v46 = vld [vmem:[%s1482_s8 + $0xd0] sm:$0xff]  ;;  %p1331_p13 = pneg %p1330_p12 }
  0x1e   : > { %1257 = vmatpush.msrb.mxu3 %v564_v17  ;;  %v301_v48 = vld [vmem:[%s1482_s8 + $0xa8] sm:$0xff]  ;;  %v307_v51 = vld [vmem:[%s1482_s8 + $0xd8] sm:$0xff]  ;;  %v302_v53 = vld [vmem:[%s1482_s8 + $0xb0] sm:$0xff] }
  0x1f   : > { %1175 = vmatmul.msk.f32.vlgmr.msra.gmra.mxu3 %vm320_vm0, %v305_v41  ;;  %v308_v56 = vld [vmem:[%s1482_s8 + $0xe0] sm:$0xff]  ;;  %v303_v58 = vld [vmem:[%s1482_s8 + $0xb8] sm:$0xff]  ;;  %v309_v61 = vld [vmem:[%s1482_s8 + $0xe8] sm:$0xff]  ;;  %p1336_p3 = pnand %p1335_p2, %p1331_p13 }
  0x20   : > { %1258 = vmatpush.msrb.mxu3 %v563_v19  ;;  %v304_v63 = vld [vmem:[%s1482_s8 + $0xc0] sm:$0xff]  ;;  %v310_v2 = vld [vmem:[%s1482_s8 + $0xf0] sm:$0xff]  ;;  %v814_v17 = vld [vmem:[%s1835_s5 + $0x18] sm:$0xff] }
  0x21   : > { %v815_v16 = vld [vmem:[%s1835_s5 + $0x20] sm:$0xff] }
  0x22   : > { %1259 = vmatpush.msrb.mxu3 %v562_v20  ;;  %v813_v20 = vld [vmem:[%s1835_s5 + $0x10] sm:$0xff] }
  0x23   : > { %1151 = vmatmul.msk.f32.gmra.mxu0 %vm320_vm0, %v281_v5 }
  0x27   : > { %1176 = vmatmul.msk.f32.gmra.mxu3 %vm320_vm0, %v306_v46 }
  0x2b   : > { %1152 = vmatmul.msk.f32.gmra.mxu0 %vm320_vm0, %v282_v6  ;;  %v311_v6 = vld [vmem:[%s1482_s8 + $0xf8] sm:$0xff]  ;;  %s270_s8 = sand.u32 1, %s1366_s25  }
  0x2c   : > { %s1147_s13 = sshll.u32 %s270_s8, 8  ;;  %s1066_s23 = scalar_lea.sflag [#allocation3], %s270_s8 }
  0x2d   : > { %s1702_s16 = scalar_lea.vmem [#allocation2], %s1147_s13 }
  0x2e   : > { %s1078_s21 = sshll.u32 %s1702_s16, 4  ;;  %s1079_s21 = int_to_ptr.vmem [resolvable:$true] %s1078_s21 }
  0x2f   : > { %1177 = vmatmul.msk.f32.gmra.mxu3 %vm320_vm0, %v307_v51 }
  0x33   : > { %1153 = vmatmul.msk.f32.gmra.mxu0 %vm320_vm0, %v283_v7 }
  0x37   : > { %1178 = vmatmul.msk.f32.gmra.mxu3 %vm320_vm0, %v308_v56 }
  0x3b   : > { %1154 = vmatmul.msk.f32.gmra.mxu0 %vm320_vm0, %v284_v8 }
  0x3f   : > { %1179 = vmatmul.msk.f32.gmra.mxu3 %vm320_vm0, %v309_v61 }
  0x43   : > { %1155 = vmatmul.msk.f32.gmra.mxu0 %vm320_vm0, %v285_v9 }
  0x47   : > { %1180 = vmatmul.msk.f32.gmra.mxu3 %vm320_vm0, %v310_v2 }
  0x4b   : > { %1156 = vmatmul.msk.f32.gmra.mxu0 %vm320_vm0, %v286_v10  ;;  %v818_v10 = vld [vmem:[%s1835_s5 + $0x38] sm:$0xff] }
  0x4c   : > { %928 = vmatpush.msra.mxu2 %v818_v10  ;;  %1260 = vmatpush.msra.mxu3 %v818_v10 }
  0x4f   : > { %1181 = vmatmul.msk.f32.gmra.mxu3 %vm320_vm0, %v311_v6 }
  0x53   : > { %1157 = vmatmul.msk.f32.gmra.mxu0 %vm320_vm0, %v287_v11 }
  0x5b   : > { %1158 = vmatmul.msk.f32.gmra.mxu0 %vm320_vm0, %v288_v12 }
  0x63   : > { %1159 = vmatmul.msk.f32.gmra.mxu0 %vm320_vm0, %v289_v13  ;;  %v817_v13 = vld [vmem:[%s1835_s5 + $0x30] sm:$0xff] }
  0x64   : > { %929 = vmatpush.msra.mxu2 %v817_v13  ;;  %1261 = vmatpush.msra.mxu3 %v817_v13 }
  0x6b   : > { %1160 = vmatmul.msk.f32.gmra.mxu0 %vm320_vm0, %v290_v14 }
  0x73   : > { %1161 = vmatmul.msk.f32.gmra.mxu0 %vm320_vm0, %v291_v15  ;;  %v816_v15 = vld [vmem:[%s1835_s5 + $0x28] sm:$0xff] }
  0x74   : > { %930 = vmatpush.msra.mxu2 %v816_v15  ;;  %1262 = vmatpush.msra.mxu3 %v816_v15 }
  0x76   : > { %931 = vmatpush.msra.mxu2 %v815_v16  ;;  %1263 = vmatpush.msra.mxu3 %v815_v16 }
  0x78   : > { %932 = vmatpush.msra.mxu2 %v814_v17  ;;  %1264 = vmatpush.msra.mxu3 %v814_v17 }
  0x7a   : > { %933 = vmatpush.msra.mxu2 %v813_v20  ;;  %1265 = vmatpush.msra.mxu3 %v813_v20 }
  0x7b   : > { %1162 = vmatmul.msk.f32.gmra.mxu0 %vm320_vm0, %v292_v18 }
  0x83   : > { %1163 = vmatmul.msk.f32.gmra.mxu0 %vm320_vm0, %v293_v21 }
  0x8b   : > { %1164 = vmatmul.msk.f32.gmra.mxu0 %vm320_vm0, %v294_v22  ;;  %v812_v22 = vld [vmem:[%s1835_s5 + $0x8] sm:$0xff] }
  0x8c   : > { %934 = vmatpush.msra.mxu2 %v812_v22  ;;  %1266 = vmatpush.msra.mxu3 %v812_v22 }
  0x93   : > { %1165 = vmatmul.msk.f32.gmra.mxu0 %vm320_vm0, %v295_v23  ;;  %v811_v23 = vld [vmem:[%s1835_s5] sm:$0xff] }
  0x94   : > { %935 = vmatpush.msra.mxu2 %v811_v23  ;;  %1267 = vmatpush.msra.mxu3 %v811_v23 }
  0x98   : > { %v434_v25 = vpop.f32.mrf.mxu0 }
  0x99   : > { %v435_v27 = vadd.f32 %v1531_v24, %v434_v25 }
  0x9b   : > { %v530_v28 = vmax.f32 %v435_v27, 0.0  ;;  %1166 = vmatmul.msk.f32.gmra.mxu0 %vm320_vm0, %v296_v26 }
  0x9d   : > { %1182 = vmatmul.msk.f32.vlgmr.msra.gmra.mxu1 %vm320_vm0, %v530_v28 }
  0xa0   : > { %v437_v29 = vpop.f32.mrf.mxu0 }
  0xa1   : > { %v438_v31 = vadd.f32 %v1531_v24, %v437_v29 }
  0xa3   : > { %v531_v32 = vmax.f32 %v438_v31, 0.0  ;;  %1167 = vmatmul.msk.f32.gmra.mxu0 %vm320_vm0, %v297_v30 }
  0xa5   : > { %1183 = vmatmul.msk.f32.gmra.mxu1 %vm320_vm0, %v531_v32 }
  0xa8   : > { %v440_v33 = vpop.f32.mrf.mxu0 }
  0xa9   : > { %v441_v35 = vadd.f32 %v1531_v24, %v440_v33 }
  0xab   : > { %v532_v36 = vmax.f32 %v441_v35, 0.0  ;;  %1168 = vmatmul.msk.f32.gmra.mxu0 %vm320_vm0, %v298_v34  ;;  %v1624_v34 = vld [vmem:[%s1834_s4] ss:$0 sm:$0xff] }
  0xad   : > { %1184 = vmatmul.msk.f32.gmra.mxu1 %vm320_vm0, %v532_v36 }
  0xb0   : > { %v443_v37 = vpop.f32.mrf.mxu0 }
  0xb1   : > { %v444_v39 = vadd.f32 %v1531_v24, %v443_v37 }
  0xb3   : > { %v533_v40 = vmax.f32 %v444_v39, 0.0  ;;  %1169 = vmatmul.msk.f32.gmra.mxu0 %vm320_vm0, %v299_v38 }
  0xb5   : > { %1185 = vmatmul.msk.f32.gmra.mxu1 %vm320_vm0, %v533_v40 }
  0xb8   : > { %v446_v42 = vpop.f32.mrf.mxu0 }
  0xb9   : > { %v447_v44 = vadd.f32 %v1531_v24, %v446_v42 }
  0xbb   : > { %v534_v45 = vmax.f32 %v447_v44, 0.0  ;;  %1170 = vmatmul.msk.f32.gmra.mxu0 %vm320_vm0, %v300_v43 }
  0xbd   : > { %1186 = vmatmul.msk.f32.gmra.mxu1 %vm320_vm0, %v534_v45 }
  0xc0   : > { %v449_v47 = vpop.f32.mrf.mxu0 }
  0xc1   : > { %v450_v49 = vadd.f32 %v1531_v24, %v449_v47 }
  0xc3   : > { %v535_v50 = vmax.f32 %v450_v49, 0.0  ;;  %1171 = vmatmul.msk.f32.gmra.mxu0 %vm320_vm0, %v301_v48 }
  0xc5   : > { %1187 = vmatmul.msk.f32.gmra.mxu1 %vm320_vm0, %v535_v50 }
  0xc8   : > { %v452_v52 = vpop.f32.mrf.mxu0 }
  0xc9   : > { %v453_v54 = vadd.f32 %v1531_v24, %v452_v52 }
  0xcb   : > { %v536_v55 = vmax.f32 %v453_v54, 0.0  ;;  %1172 = vmatmul.msk.f32.gmra.mxu0 %vm320_vm0, %v302_v53 }
  0xcd   : > { %1188 = vmatmul.msk.f32.gmra.mxu1 %vm320_vm0, %v536_v55 }
  0xd0   : > { %v455_v57 = vpop.f32.mrf.mxu0 }
  0xd1   : > { %v456_v59 = vadd.f32 %v1531_v24, %v455_v57 }
  0xd3   : > { %v537_v60 = vmax.f32 %v456_v59, 0.0  ;;  %1173 = vmatmul.msk.f32.gmra.mxu0 %vm320_vm0, %v303_v58 }
  0xd5   : > { %1189 = vmatmul.msk.f32.gmra.mxu1 %vm320_vm0, %v537_v60 }
  0xd8   : > { %v458_v62 = vpop.f32.mrf.mxu0 }
  0xd9   : > { %v459_v0 = vadd.f32 %v1531_v24, %v458_v62  ;;  %v509_v62 = vpop.f32.mrf.mxu3 }
  0xdb   : > { %v538_v1 = vmax.f32 %v459_v0, 0.0  ;;  %1174 = vmatmul.msk.f32.gmra.mxu0 %vm320_vm0, %v304_v63 }
  0xdd   : > { %1190 = vmatmul.msk.f32.gmra.mxu1 %vm320_vm0, %v538_v1  ;;  %v510_v1 = vadd.f32 %v1531_v24, %v509_v62 }
  0xe0   : > { %v461_v3 = vpop.f32.mrf.mxu0 }
  0xe1   : > { %v462_v4 = vadd.f32 %v1531_v24, %v461_v3  ;;  %v555_v3 = vmax.f32 %v510_v1, 0.0 }
  0xe3   : > { %v539_v5 = vmax.f32 %v462_v4, 0.0  ;;  %1207 = vmatmul.msk.f32.vlgmr.msrb.gmra.mxu3 %vm320_vm0, %v555_v3 }
  0xe5   : > { %1191 = vmatmul.msk.f32.gmra.mxu1 %vm320_vm0, %v539_v5 }
  0xe8   : > { %v464_v7 = vpop.f32.mrf.mxu0 }
  0xe9   : > { %v465_v8 = vadd.f32 %v1531_v24, %v464_v7  ;;  %v512_v7 = vpop.f32.mrf.mxu3 }
  0xea   : > { %v513_v10 = vadd.f32 %v1531_v24, %v512_v7  ;;  %v1698_v7 = vld [vmem:[%s1836_s6] ss:$0 sm:$0xff] }
  0xeb   : > { %v540_v9 = vmax.f32 %v465_v8, 0.0 }
  0xed   : > { %1192 = vmatmul.msk.f32.gmra.mxu1 %vm320_vm0, %v540_v9 }
  0xf0   : > { %v467_v11 = vpop.f32.mrf.mxu0 }
  0xf1   : > { %v468_v12 = vadd.f32 %v1531_v24, %v467_v11  ;;  %v515_v16 = vpop.f32.mrf.mxu3 }
  0xf3   : > { %v541_v14 = vmax.f32 %v468_v12, 0.0  ;;  %v556_v12 = vmax.f32 %v513_v10, 0.0 }
  0xf5   : > { %1193 = vmatmul.msk.f32.gmra.mxu1 %vm320_vm0, %v541_v14  ;;  %1208 = vmatmul.msk.f32.gmra.mxu3 %vm320_vm0, %v556_v12 }
  0xf8   : > { %v470_v18 = vpop.f32.mrf.mxu0 }
  0xf9   : > { %v471_v19 = vadd.f32 %v1531_v24, %v470_v18 }
  0xfb   : > { %v542_v21 = vmax.f32 %v471_v19, 0.0  ;;  %v516_v19 = vadd.f32 %v1531_v24, %v515_v16 }
  0xfd   : > { %1194 = vmatmul.msk.f32.gmra.mxu1 %vm320_vm0, %v542_v21  ;;  %v557_v21 = vmax.f32 %v516_v19, 0.0 }
  0xff   : > { %1209 = vmatmul.msk.f32.gmra.mxu3 %vm320_vm0, %v557_v21 }
 0x100   : > { %v473_v25 = vpop.f32.mrf.mxu0 }
 0x101   : > { %v474_v26 = vadd.f32 %v1531_v24, %v473_v25 }
 0x103   : > { %v543_v27 = vmax.f32 %v474_v26, 0.0  ;;  %v518_v26 = vpop.f32.mrf.mxu3 }
 0x105   : > { %1195 = vmatmul.msk.f32.gmra.mxu1 %vm320_vm0, %v543_v27 }
 0x108   : > { %v476_v28 = vpop.f32.mrf.mxu0 }
 0x109   : > { %v477_v29 = vadd.f32 %v1531_v24, %v476_v28 }
 0x10b   : > { %v544_v30 = vmax.f32 %v477_v29, 0.0  ;;  %v519_v29 = vadd.f32 %v1531_v24, %v518_v26 }
 0x10d   : > { %1196 = vmatmul.msk.f32.gmra.mxu1 %vm320_vm0, %v544_v30 }
 0x110   : > { %v479_v31 = vpop.f32.mrf.mxu0 }
 0x111   : > { %v480_v32 = vadd.f32 %v1531_v24, %v479_v31  ;;  %v558_v31 = vmax.f32 %v519_v29, 0.0 }
 0x113   : > { %v545_v33 = vmax.f32 %v480_v32, 0.0  ;;  %1210 = vmatmul.msk.f32.gmra.mxu3 %vm320_vm0, %v558_v31 }
 0x115   : > { %1197 = vmatmul.msk.f32.gmra.mxu1 %vm320_vm0, %v545_v33 }
 0x118   : > { %v482_v35 = vpop.f32.mrf.mxu0 }
 0x119   : > { %v483_v36 = vadd.f32 %v1531_v24, %v482_v35 }
 0x11a   : > { %v683_v37 = vpop.f32.mrf.mxu1 }
 0x11b   : > { %v546_v38 = vmax.f32 %v483_v36, 0.0  ;;  %v684_v39 = vadd.f32 %v1624_v34, %v683_v37  ;;  %v521_v36 = vpop.f32.mrf.mxu3 }
 0x11d   : > { %v779_v40 = vmax.f32 %v684_v39, 0.0  ;;  %1198 = vmatmul.msk.f32.gmra.mxu1 %vm320_vm0, %v546_v38  ;;  %v522_v39 = vadd.f32 %v1531_v24, %v521_v36 }
 0x11f   : > { %1214 = vmatmul.msk.f32.vlgmr.msra.gmra.mxu2 %vm823_vm1, %v779_v40 }
 0x120   : > { %v485_v41 = vpop.f32.mrf.mxu0 }
 0x121   : > { %v486_v42 = vadd.f32 %v1531_v24, %v485_v41  ;;  %v559_v41 = vmax.f32 %v522_v39, 0.0 }
 0x122   : > { %v686_v43 = vpop.f32.mrf.mxu1 }
 0x123   : > { %v547_v44 = vmax.f32 %v486_v42, 0.0  ;;  %v687_v45 = vadd.f32 %v1624_v34, %v686_v43  ;;  %1211 = vmatmul.msk.f32.gmra.mxu3 %vm320_vm0, %v559_v41  ;;  %v524_v43 = vpop.f32.mrf.mxu3 }
 0x125   : > { %v780_v46 = vmax.f32 %v687_v45, 0.0  ;;  %1199 = vmatmul.msk.f32.gmra.mxu1 %vm320_vm0, %v547_v44  ;;  %v525_v45 = vadd.f32 %v1531_v24, %v524_v43 }
 0x127   : > { %1215 = vmatmul.msk.f32.gmra.mxu2 %vm823_vm1, %v780_v46 }
 0x128   : > { %v488_v47 = vpop.f32.mrf.mxu0 }
 0x129   : > { %v489_v48 = vadd.f32 %v1531_v24, %v488_v47  ;;  %v560_v47 = vmax.f32 %v525_v45, 0.0 }
 0x12a   : > { %v689_v49 = vpop.f32.mrf.mxu1 }
 0x12b   : > { %v548_v50 = vmax.f32 %v489_v48, 0.0  ;;  %v690_v51 = vadd.f32 %v1624_v34, %v689_v49  ;;  %1212 = vmatmul.msk.f32.gmra.mxu3 %vm320_vm0, %v560_v47  ;;  %v527_v49 = vpop.f32.mrf.mxu3 }
 0x12d   : > { %v781_v52 = vmax.f32 %v690_v51, 0.0  ;;  %1200 = vmatmul.msk.f32.gmra.mxu1 %vm320_vm0, %v548_v50  ;;  %v528_v51 = vadd.f32 %v1531_v24, %v527_v49 }
 0x12f   : > { %1216 = vmatmul.msk.f32.gmra.mxu2 %vm823_vm1, %v781_v52 }
 0x130   : > { %v491_v53 = vpop.f32.mrf.mxu0 }
 0x131   : > { %v492_v54 = vadd.f32 %v1531_v24, %v491_v53  ;;  %v561_v53 = vmax.f32 %v528_v51, 0.0 }
 0x132   : > { %v692_v55 = vpop.f32.mrf.mxu1 }
 0x133   : > { %v549_v56 = vmax.f32 %v492_v54, 0.0  ;;  %v693_v57 = vadd.f32 %v1624_v34, %v692_v55  ;;  %1213 = vmatmul.msk.f32.gmra.mxu3 %vm320_vm0, %v561_v53 }
 0x135   : > { %v782_v58 = vmax.f32 %v693_v57, 0.0  ;;  %1201 = vmatmul.msk.f32.gmra.mxu1 %vm320_vm0, %v549_v56 }
 0x137   : > { %1217 = vmatmul.msk.f32.gmra.mxu2 %vm823_vm1, %v782_v58 }
 0x138   : > { %v494_v59 = vpop.f32.mrf.mxu0 }
 0x139   : > { %v495_v60 = vadd.f32 %v1531_v24, %v494_v59 }
 0x13a   : > { %v695_v61 = vpop.f32.mrf.mxu1 }
 0x13b   : > { %v550_v63 = vmax.f32 %v495_v60, 0.0  ;;  %v696_v0 = vadd.f32 %v1624_v34, %v695_v61 }
 0x13d   : > { %v783_v2 = vmax.f32 %v696_v0, 0.0  ;;  %1202 = vmatmul.msk.f32.gmra.mxu1 %vm320_vm0, %v550_v63 }
 0x13f   : > { %1218 = vmatmul.msk.f32.gmra.mxu2 %vm823_vm1, %v783_v2 }
 0x140   : > { %v497_v4 = vpop.f32.mrf.mxu0 }
 0x141   : > { %v498_v5 = vadd.f32 %v1531_v24, %v497_v4 }
 0x142   : > { %v698_v6 = vpop.f32.mrf.mxu1 }
 0x143   : > { %v551_v8 = vmax.f32 %v498_v5, 0.0  ;;  %v699_v9 = vadd.f32 %v1624_v34, %v698_v6 }
 0x145   : > { %v784_v11 = vmax.f32 %v699_v9, 0.0  ;;  %1203 = vmatmul.msk.f32.gmra.mxu1 %vm320_vm0, %v551_v8 }
 0x147   : > { %1219 = vmatmul.msk.f32.gmra.mxu2 %vm823_vm1, %v784_v11 }
 0x148   : > { %v500_v13 = vpop.f32.mrf.mxu0 }
 0x149   : > { %v501_v14 = vadd.f32 %v1531_v24, %v500_v13 }
 0x14a   : > { %v701_v15 = vpop.f32.mrf.mxu1 }
 0x14b   : > { %v552_v17 = vmax.f32 %v501_v14, 0.0  ;;  %v702_v18 = vadd.f32 %v1624_v34, %v701_v15 }
 0x14d   : > { %v785_v20 = vmax.f32 %v702_v18, 0.0  ;;  %1204 = vmatmul.msk.f32.gmra.mxu1 %vm320_vm0, %v552_v17 }
 0x14f   : > { %1220 = vmatmul.msk.f32.gmra.mxu2 %vm823_vm1, %v785_v20 }
 0x150   : > { %v503_v22 = vpop.f32.mrf.mxu0 }
 0x151   : > { %v504_v23 = vadd.f32 %v1531_v24, %v503_v22 }
 0x152   : > { %v704_v25 = vpop.f32.mrf.mxu1 }
 0x153   : > { %v553_v27 = vmax.f32 %v504_v23, 0.0  ;;  %v705_v28 = vadd.f32 %v1624_v34, %v704_v25 }
 0x155   : > { %v786_v30 = vmax.f32 %v705_v28, 0.0  ;;  %1205 = vmatmul.msk.f32.gmra.mxu1 %vm320_vm0, %v553_v27 }
 0x157   : > { %1221 = vmatmul.msk.f32.gmra.mxu2 %vm823_vm1, %v786_v30 }
 0x158   : > { %v506_v32 = vpop.f32.mrf.mxu0 }
 0x159   : > { %v507_v33 = vadd.f32 %v1531_v24, %v506_v32 }
 0x15a   : > { %v707_v35 = vpop.f32.mrf.mxu1 }
 0x15b   : > { %v554_v37 = vmax.f32 %v507_v33, 0.0  ;;  %v708_v38 = vadd.f32 %v1624_v34, %v707_v35 }
 0x15d   : > { %v787_v40 = vmax.f32 %v708_v38, 0.0  ;;  %1206 = vmatmul.msk.f32.gmra.mxu1 %vm320_vm0, %v554_v37 }
 0x15f   : > { %1222 = vmatmul.msk.f32.gmra.mxu2 %vm823_vm1, %v787_v40 }
 0x162   : > { %v710_v42 = vpop.f32.mrf.mxu1 }
 0x163   : > { %v711_v44 = vadd.f32 %v1624_v34, %v710_v42 }
 0x165   : > { %v788_v46 = vmax.f32 %v711_v44, 0.0 }
 0x166   : > { %v758_v40 = vpop.f32.mrf.mxu3 }
 0x167   : > { %1223 = vmatmul.msk.f32.gmra.mxu2 %vm823_vm1, %v788_v46 }
 0x16a   : > { %v713_v48 = vpop.f32.mrf.mxu1 }
 0x16b   : > { %v714_v50 = vadd.f32 %v1624_v34, %v713_v48 }
 0x16d   : > { %v789_v52 = vmax.f32 %v714_v50, 0.0 }
 0x16f   : > { %1224 = vmatmul.msk.f32.gmra.mxu2 %vm823_vm1, %v789_v52  ;;  %v759_v52 = vadd.f32 %v1624_v34, %v758_v40 }
 0x172   : > { %v716_v54 = vpop.f32.mrf.mxu1 }
 0x173   : > { %v717_v55 = vadd.f32 %v1624_v34, %v716_v54  ;;  %v804_v54 = vmax.f32 %v759_v52, 0.0 }
 0x175   : > { %v790_v56 = vmax.f32 %v717_v55, 0.0 }
 0x177   : > { %1225 = vmatmul.msk.f32.gmra.mxu2 %vm823_vm1, %v790_v56 }
 0x178   : > { %v761_v46 = vpop.f32.mrf.mxu3 }
 0x17a   : > { %v719_v57 = vpop.f32.mrf.mxu1 }
 0x17b   : > { %v720_v58 = vadd.f32 %v1624_v34, %v719_v57  ;;  %v762_v57 = vadd.f32 %v1624_v34, %v761_v46 }
 0x17d   : > { %v791_v59 = vmax.f32 %v720_v58, 0.0 }
 0x17f   : > { %1226 = vmatmul.msk.f32.gmra.mxu2 %vm823_vm1, %v791_v59  ;;  %v805_v59 = vmax.f32 %v762_v57, 0.0 }
 0x182   : > { %v722_v24 = vpop.f32.mrf.mxu1  ;;  %v764_v56 = vpop.f32.mrf.mxu3 }
 0x183   : > { %v723_v60 = vadd.f32 %v1624_v34, %v722_v24 }
 0x185   : > { %v792_v61 = vmax.f32 %v723_v60, 0.0 }
 0x187   : > { %1227 = vmatmul.msk.f32.gmra.mxu2 %vm823_vm1, %v792_v61  ;;  %v765_v61 = vadd.f32 %v1624_v34, %v764_v56 }
 0x18a   : > { %v725_v62 = vpop.f32.mrf.mxu1 }
 0x18b   : > { %v726_v63 = vadd.f32 %v1624_v34, %v725_v62 }
 0x18d   : > { %v793_v0 = vmax.f32 %v726_v63, 0.0  ;;  %v806_v63 = vmax.f32 %v765_v61, 0.0 }
 0x18f   : > { %1228 = vmatmul.msk.f32.gmra.mxu2 %vm823_vm1, %v793_v0 }
 0x192   : > { %v728_v1 = vpop.f32.mrf.mxu1 }
 0x193   : > { %v729_v2 = vadd.f32 %v1624_v34, %v728_v1 }
 0x195   : > { %v794_v3 = vmax.f32 %v729_v2, 0.0 }
 0x196   : > { %v767_v60 = vpop.f32.mrf.mxu3 }
 0x197   : > { %1229 = vmatmul.msk.f32.gmra.mxu2 %vm823_vm1, %v794_v3  ;;  %v768_v1 = vadd.f32 %v1624_v34, %v767_v60 }
 0x19a   : > { %v731_v4 = vpop.f32.mrf.mxu1 }
 0x19b   : > { %v732_v5 = vadd.f32 %v1624_v34, %v731_v4  ;;  %v807_v4 = vmax.f32 %v768_v1, 0.0 }
 0x19d   : > { %v795_v6 = vmax.f32 %v732_v5, 0.0 }
 0x19f   : > { %1230 = vmatmul.msk.f32.gmra.mxu2 %vm823_vm1, %v795_v6 }
 0x1a2   : > { %v734_v8 = vpop.f32.mrf.mxu1  ;;  %v937_v9 = vpop.f32.mrf.mxu2 }
 0x1a3   : > { %v735_v10 = vadd.f32 %v1624_v34, %v734_v8  ;;  %v938_v11 = vadd.f32 %v1698_v7, %v937_v9 }
 0x1a5   : > { %v796_v12 = vmax.f32 %v735_v10, 0.0  ;;  %1033 = vst [vmem:[%s1702_s16] sm:$0xff] %v938_v11 }
 0x1a6   : > { %v770_v2 = vpop.f32.mrf.mxu3 }
 0x1a7   : > { %1231 = vmatmul.msk.f32.gmra.mxu2 %vm823_vm1, %v796_v12  ;;  %v771_v6 = vadd.f32 %v1624_v34, %v770_v2 }
 0x1a9   : > { %v808_v10 = vmax.f32 %v771_v6, 0.0 }
 0x1aa   : > { %v737_v13 = vpop.f32.mrf.mxu1  ;;  %v940_v14 = vpop.f32.mrf.mxu2 }
 0x1ab   : > { %v738_v15 = vadd.f32 %v1624_v34, %v737_v13  ;;  %v941_v16 = vadd.f32 %v1698_v7, %v940_v14 }
 0x1ad   : > { %v797_v17 = vmax.f32 %v738_v15, 0.0  ;;  %1034 = vst [vmem:[%s1702_s16 + $0x8] sm:$0xff] %v941_v16 }
 0x1ae   : > { %v773_v9 = vpop.f32.mrf.mxu3 }
 0x1af   : > { %1232 = vmatmul.msk.f32.gmra.mxu2 %vm823_vm1, %v797_v17  ;;  %v774_v12 = vadd.f32 %v1624_v34, %v773_v9 }
 0x1b1   : > { %v809_v14 = vmax.f32 %v774_v12, 0.0 }
 0x1b2   : > { %v740_v18 = vpop.f32.mrf.mxu1  ;;  %v943_v19 = vpop.f32.mrf.mxu2 }
 0x1b3   : > { %v741_v20 = vadd.f32 %v1624_v34, %v740_v18  ;;  %v944_v21 = vadd.f32 %v1698_v7, %v943_v19 }
 0x1b5   : > { %v798_v22 = vmax.f32 %v741_v20, 0.0  ;;  %1035 = vst [vmem:[%s1702_s16 + $0x10] sm:$0xff] %v944_v21 }
 0x1b6   : > { %v776_v16 = vpop.f32.mrf.mxu3 }
 0x1b7   : > { %1233 = vmatmul.msk.f32.gmra.mxu2 %vm823_vm1, %v798_v22  ;;  %v777_v17 = vadd.f32 %v1624_v34, %v776_v16 }
 0x1b9   : > { %v810_v19 = vmax.f32 %v777_v17, 0.0 }
 0x1ba   : > { %v743_v23 = vpop.f32.mrf.mxu1  ;;  %v946_v25 = vpop.f32.mrf.mxu2 }
 0x1bb   : > { %v744_v26 = vadd.f32 %v1624_v34, %v743_v23  ;;  %v947_v27 = vadd.f32 %v1698_v7, %v946_v25 }
 0x1bd   : > { %v799_v28 = vmax.f32 %v744_v26, 0.0  ;;  %1036 = vst [vmem:[%s1702_s16 + $0x18] sm:$0xff] %v947_v27 }
 0x1bf   : > { %1234 = vmatmul.msk.f32.gmra.mxu2 %vm823_vm1, %v799_v28 }
 0x1c2   : > { %v746_v29 = vpop.f32.mrf.mxu1  ;;  %v949_v30 = vpop.f32.mrf.mxu2 }
 0x1c3   : > { %v747_v31 = vadd.f32 %v1624_v34, %v746_v29  ;;  %v950_v32 = vadd.f32 %v1698_v7, %v949_v30 }
 0x1c5   : > { %v800_v33 = vmax.f32 %v747_v31, 0.0  ;;  %1037 = vst [vmem:[%s1702_s16 + $0x20] sm:$0xff] %v950_v32 }
 0x1c7   : > { %1235 = vmatmul.msk.f32.gmra.mxu2 %vm823_vm1, %v800_v33 }
 0x1ca   : > { %v749_v35 = vpop.f32.mrf.mxu1  ;;  %v952_v36 = vpop.f32.mrf.mxu2 }
 0x1cb   : > { %v750_v37 = vadd.f32 %v1624_v34, %v749_v35  ;;  %v953_v38 = vadd.f32 %v1698_v7, %v952_v36 }
 0x1cd   : > { %v801_v39 = vmax.f32 %v750_v37, 0.0  ;;  %1038 = vst [vmem:[%s1702_s16 + $0x28] sm:$0xff] %v953_v38 }
 0x1cf   : > { %1236 = vmatmul.msk.f32.gmra.mxu2 %vm823_vm1, %v801_v39 }
 0x1d2   : > { %v752_v41 = vpop.f32.mrf.mxu1  ;;  %v955_v42 = vpop.f32.mrf.mxu2 }
 0x1d3   : > { %v753_v43 = vadd.f32 %v1624_v34, %v752_v41  ;;  %v956_v44 = vadd.f32 %v1698_v7, %v955_v42 }
 0x1d5   : > { %v802_v45 = vmax.f32 %v753_v43, 0.0  ;;  %1039 = vst [vmem:[%s1702_s16 + $0x30] sm:$0xff] %v956_v44 }
 0x1d7   : > { %1237 = vmatmul.msk.f32.gmra.mxu2 %vm823_vm1, %v802_v45 }
 0x1da   : > { %v755_v47 = vpop.f32.mrf.mxu1  ;;  %v958_v48 = vpop.f32.mrf.mxu2 }
 0x1db   : > { %v756_v49 = vadd.f32 %v1624_v34, %v755_v47  ;;  %v959_v50 = vadd.f32 %v1698_v7, %v958_v48 }
 0x1dd   : > { %v803_v51 = vmax.f32 %v756_v49, 0.0  ;;  %1040 = vst [vmem:[%s1702_s16 + $0x38] sm:$0xff] %v959_v50 }
 0x1df   : > { %1238 = vmatmul.msk.f32.vlgmr.msra.gmra.mxu3 %vm823_vm1, %v803_v51 }
 0x1e2   : > { %v961_v53 = vpop.f32.mrf.mxu2 }
 0x1e3   : > { %v962_v55 = vadd.f32 %v1698_v7, %v961_v53 }
 0x1e5   : > { %1041 = vst [vmem:[%s1702_s16 + $0x40] sm:$0xff] %v962_v55 }
 0x1e7   : > { %1239 = vmatmul.msk.f32.gmra.mxu3 %vm823_vm1, %v804_v54 }
 0x1ea   : > { %v964_v58 = vpop.f32.mrf.mxu2 }
 0x1eb   : > { %v965_v24 = vadd.f32 %v1698_v7, %v964_v58 }
 0x1ed   : > { %1042 = vst [vmem:[%s1702_s16 + $0x48] sm:$0xff] %v965_v24 }
 0x1ef   : > { %1240 = vmatmul.msk.f32.gmra.mxu3 %vm823_vm1, %v805_v59 }
 0x1f2   : > { %v967_v62 = vpop.f32.mrf.mxu2 }
 0x1f3   : > { %v968_v0 = vadd.f32 %v1698_v7, %v967_v62 }
 0x1f5   : > { %1043 = vst [vmem:[%s1702_s16 + $0x50] sm:$0xff] %v968_v0 }
 0x1f7   : > { %1241 = vmatmul.msk.f32.gmra.mxu3 %vm823_vm1, %v806_v63 }
 0x1fa   : > { %v970_v3 = vpop.f32.mrf.mxu2 }
 0x1fb   : > { %v971_v5 = vadd.f32 %v1698_v7, %v970_v3 }
 0x1fd   : > { %1044 = vst [vmem:[%s1702_s16 + $0x58] sm:$0xff] %v971_v5 }
 0x1ff   : > { %1242 = vmatmul.msk.f32.gmra.mxu3 %vm823_vm1, %v807_v4 }
 0x202   : > { %v973_v8 = vpop.f32.mrf.mxu2 }
 0x203   : > { %v974_v11 = vadd.f32 %v1698_v7, %v973_v8 }
 0x205   : > { %1045 = vst [vmem:[%s1702_s16 + $0x60] sm:$0xff] %v974_v11 }
 0x207   : > { %1243 = vmatmul.msk.f32.gmra.mxu3 %vm823_vm1, %v808_v10 }
 0x20a   : > { %v976_v13 = vpop.f32.mrf.mxu2 }
 0x20b   : > { %v977_v15 = vadd.f32 %v1698_v7, %v976_v13 }
 0x20d   : > { %1046 = vst [vmem:[%s1702_s16 + $0x68] sm:$0xff] %v977_v15 }
 0x20f   : > { %1244 = vmatmul.msk.f32.gmra.mxu3 %vm823_vm1, %v809_v14 }
 0x212   : > { %v979_v18 = vpop.f32.mrf.mxu2 }
 0x213   : > { %v980_v20 = vadd.f32 %v1698_v7, %v979_v18 }
 0x215   : > { %1047 = vst [vmem:[%s1702_s16 + $0x70] sm:$0xff] %v980_v20 }
 0x217   : > { %1245 = vmatmul.msk.f32.gmra.mxu3 %vm823_vm1, %v810_v19 }
 0x21a   : > { %v982_v21 = vpop.f32.mrf.mxu2 }
 0x21b   : > { %v983_v22 = vadd.f32 %v1698_v7, %v982_v21 }
 0x21d   : > { %1048 = vst [vmem:[%s1702_s16 + $0x78] sm:$0xff] %v983_v22 }
 0x222   : > { %v985_v23 = vpop.f32.mrf.mxu2 }
 0x223   : > { %v986_v25 = vadd.f32 %v1698_v7, %v985_v23 }
 0x225   : > { %1049 = vst [vmem:[%s1702_s16 + $0x80] sm:$0xff] %v986_v25 }
 0x22a   : > { %v988_v34 = vpop.f32.mrf.mxu2 }
 0x22b   : > { %v989_v26 = vadd.f32 %v1698_v7, %v988_v34 }
 0x22d   : > { %1050 = vst [vmem:[%s1702_s16 + $0x88] sm:$0xff] %v989_v26 }
 0x232   : > { %v991_v27 = vpop.f32.mrf.mxu2 }
 0x233   : > { %v992_v28 = vadd.f32 %v1698_v7, %v991_v27 }
 0x235   : > { %1051 = vst [vmem:[%s1702_s16 + $0x90] sm:$0xff] %v992_v28 }
 0x23a   : > { %v994_v29 = vpop.f32.mrf.mxu2 }
 0x23b   : > { %v995_v30 = vadd.f32 %v1698_v7, %v994_v29 }
 0x23d   : > { %1052 = vst [vmem:[%s1702_s16 + $0x98] sm:$0xff] %v995_v30 }
 0x242   : > { %v997_v31 = vpop.f32.mrf.mxu2 }
 0x243   : > { %v998_v32 = vadd.f32 %v1698_v7, %v997_v31 }
 0x245   : > { %1053 = vst [vmem:[%s1702_s16 + $0xa0] sm:$0xff] %v998_v32 }
 0x24a   : > { %v1000_v33 = vpop.f32.mrf.mxu2 }
 0x24b   : > { %v1001_v35 = vadd.f32 %v1698_v7, %v1000_v33 }
 0x24d   : > { %1054 = vst [vmem:[%s1702_s16 + $0xa8] sm:$0xff] %v1001_v35 }
 0x252   : > { %v1003_v36 = vpop.f32.mrf.mxu2 }
 0x253   : > { %v1004_v37 = vadd.f32 %v1698_v7, %v1003_v36 }
 0x255   : > { %1055 = vst [vmem:[%s1702_s16 + $0xb0] sm:$0xff] %v1004_v37 }
 0x25a   : > { %v1006_v38 = vpop.f32.mrf.mxu2 }
 0x25b   : > { %v1007_v39 = vadd.f32 %v1698_v7, %v1006_v38 }
 0x25d   : > { %1056 = vst [vmem:[%s1702_s16 + $0xb8] sm:$0xff] %v1007_v39 }
 0x262   : > { %v1009_v40 = vpop.f32.mrf.mxu3 }
 0x263   : > { %v1010_v41 = vadd.f32 %v1698_v7, %v1009_v40 }
 0x265   : > { %1057 = vst [vmem:[%s1702_s16 + $0xc0] sm:$0xff] %v1010_v41 }
 0x26a   : > { %v1012_v42 = vpop.f32.mrf.mxu3 }
 0x26b   : > { %v1013_v43 = vadd.f32 %v1698_v7, %v1012_v42 }
 0x26d   : > { %1058 = vst [vmem:[%s1702_s16 + $0xc8] sm:$0xff] %v1013_v43 }
 0x272   : > { %v1015_v44 = vpop.f32.mrf.mxu3 }
 0x273   : > { %v1016_v45 = vadd.f32 %v1698_v7, %v1015_v44 }
 0x275   : > { %1059 = vst [vmem:[%s1702_s16 + $0xd0] sm:$0xff] %v1016_v45 }
 0x27a   : > { %v1018_v46 = vpop.f32.mrf.mxu3 }
 0x27b   : > { %v1019_v47 = vadd.f32 %v1698_v7, %v1018_v46 }
 0x27d   : > { %1060 = vst [vmem:[%s1702_s16 + $0xd8] sm:$0xff] %v1019_v47 }
 0x282   : > { %v1021_v48 = vpop.f32.mrf.mxu3 }
 0x283   : > { %v1022_v49 = vadd.f32 %v1698_v7, %v1021_v48 }
 0x285   : > { %1061 = vst [vmem:[%s1702_s16 + $0xe0] sm:$0xff] %v1022_v49 }
 0x28a   : > { %v1024_v50 = vpop.f32.mrf.mxu3 }
 0x28b   : > { %v1025_v51 = vadd.f32 %v1698_v7, %v1024_v50 }
 0x28d   : > { %1062 = vst [vmem:[%s1702_s16 + $0xe8] sm:$0xff] %v1025_v51 }
 0x292   : > { %v1027_v52 = vpop.f32.mrf.mxu3 }
 0x293   : > { %v1028_v53 = vadd.f32 %v1698_v7, %v1027_v52 }
 0x295   : > { %1063 = vst [vmem:[%s1702_s16 + $0xf0] sm:$0xff] %v1028_v53 }
 0x29a   : > { %v1030_v54 = vpop.f32.mrf.mxu3 }
 0x29b   : > { %v1031_v55 = vadd.f32 %v1698_v7, %v1030_v54 }
 0x29d   : > { %1064 = vst [vmem:[%s1702_s16 + $0xf8] sm:$0xff] %v1031_v55 }
 0x29e   : > { %1339 = shalt.err (!%p1336_p3)
}
 0x29f   : > { %s1376_s8 = smov 128   ;;  %s1377_s16 = smov 8  }
 0x2a0   : > { %1268 = dma.vmem_to_hbm [thread:$0]  (%p1456_p5), %s1079_s21, 4096, %s1081_s22, %s1066_s23, %s1376_s8, %s1376_s8, %s1377_s16  }
 0x2a1 PF: > { %p1274_p4 = scmp.ge.s32.totalorder %s1374_s27, 2  ;;  %s1095_s18 = sand.u32 1, %s1362_s24  }
 0x2a2   : > { %s1096_s19 = scalar_lea.sflag [#allocation3], %s1095_s18 }
 0x2a3   : > { %p1271_p7 = pnand %p1274_p4, %p1460_p6 }
 0x2a5   : > { %p1272_p8 = pneg %p1271_p7 }
 0x2a7   : > { %1357 = dma.done.wait (%p1272_p8), %s1096_s19, 4096  }
 0x2a8   : > { %1359 = vsyncadd (%p1272_p8), %s1096_s19, 4294963200  ;;  %p17_p9 = scmp.ge.s32.totalorder %s1443_s30, 4   ;;  %s1840_s24 = smov %s1366_s25 }
 0x2a9   : > { %s1841_s25 = smov %s1370_s26  ;;  %s1842_s26 = smov %s1454_s10 }
 0x2aa   : > { %s1843_s27 = smov %s1443_s30  ;;  %19 = sbr.rel (!%p17_p9) target bundleno = 3 (0x3), region = 83 }
 0x2af   :  { %1102 = vsyncpa [#allocation3], 1 }
 0x2b0   :  { %1104 = vsyncpa [#allocation3 + $0x1], 1 }

</bundles_post_ra>
